<compile_context>
chip_gen: v7x
topology: tpu7x:2x2x1
jax: 0.10.0
libtpu: 0.0.40
codegen_flags: <defaults>
</compile_context>

<pallas_src>
import jax
import jax.numpy as jnp
from jax.experimental import pallas as pl
from jax.experimental.pallas import tpu as pltpu

LANE = 128   # vreg lane width


def _round_up(n, m):
    return ((n + m - 1) // m) * m


def _pad2d(a, rows, cols):
    r, c = a.shape
    if r == rows and c == cols:
        return a
    return jnp.pad(a, ((0, rows - r), (0, cols - c)))


def _sequential_kernel(x_ref, w1_ref, b1_ref, w2_ref, b2_ref, o_ref):
    # --- module 0: Linear(D_in -> D_hid) ---
    # Cast the streamed f32 activation tile to bf16 right before the MXU
    # (free VPU op); accumulate in f32 on the MXU.
    x = x_ref[...].astype(w1_ref.dtype)
    h = jnp.dot(x, w1_ref[...], preferred_element_type=jnp.float32)
    h = h + b1_ref[...]                       # f32 epilogue (bias broadcast)
    # --- module 1: callable relu ---
    h = jnp.maximum(h, 0.0)
    # --- module 2: Linear(D_hid -> D_out) ---
    y = jnp.dot(h.astype(w2_ref.dtype), w2_ref[...],
                preferred_element_type=jnp.float32)
    y = y + b2_ref[...]
    o_ref[...] = y.astype(o_ref.dtype)        # late cast at the store


def prepare_params(params, compute_dtype=jnp.bfloat16):
    """One-time (init-path) weight prep: pad hidden dim to 128 lanes, cast to
    the MXU compute dtype.  K (=D_in) and N (=D_out) stay unpadded."""
    w1, b1, w2, b2 = params
    D_in, D_hid = w1.shape
    D_out = w2.shape[1]
    Dp_hid = _round_up(D_hid, LANE)           # lane-dense intermediate
    w1p = _pad2d(w1, D_in, Dp_hid).astype(compute_dtype)
    b1p = _pad2d(jnp.reshape(b1, (1, -1)), 1, Dp_hid).astype(jnp.float32)
    w2p = _pad2d(w2, Dp_hid, D_out).astype(compute_dtype)
    b2p = jnp.reshape(b2, (1, -1)).astype(jnp.float32)
    return w1p, b1p, w2p, b2p


def sequential_forward(x, prepared, *, block_b=1024, out_dtype=jnp.bfloat16):
    """Fused forward of Sequential(Linear, relu, Linear) via one pallas_call.

    `prepared` must come from prepare_params().  Output dtype defaults to
    bf16 (halves the dominant HBM output stream); pass out_dtype=jnp.float32
    if the consumer needs f32.
    """
    w1p, b1p, w2p, b2p = prepared
    B, D_in = x.shape
    Dp_hid = w1p.shape[1]
    D_out = w2p.shape[1]

    # Batch tiling.  Feature dims (D_in / D_out) use full-extent blocks, so
    # they are legal at any size; only the batch axis is tiled.
    if B <= block_b:
        if B >= 32 and B % 32 == 0:
            TB = B // 2        # give v7x's second TensorCore a tile
        else:
            TB = B             # single tile == full dim (always legal)
        Bp = B
    else:
        TB = _round_up(block_b, 16)          # bf16 sublane packing
        Bp = _round_up(B, TB)

    xp = x if Bp == B else jnp.pad(x, ((0, Bp - B), (0, 0)))
    grid = (Bp // TB,)

    w_isz = jnp.dtype(w1p.dtype).itemsize
    flops = 2 * Bp * (D_in * Dp_hid + Dp_hid * D_out)
    bytes_accessed = (
        Bp * D_in * jnp.dtype(x.dtype).itemsize          # x read (f32)
        + D_in * Dp_hid * w_isz + Dp_hid * 4              # w1 + b1
        + Dp_hid * D_out * w_isz + D_out * 4              # w2 + b2
        + Bp * D_out * jnp.dtype(out_dtype).itemsize      # out write
    )

    out = pl.pallas_call(
        _sequential_kernel,
        out_shape=jax.ShapeDtypeStruct((Bp, D_out), out_dtype),
        grid_spec=pltpu.PrefetchScalarGridSpec(
            num_scalar_prefetch=0,
            grid=grid,
            in_specs=[
                # x streamed by batch tile; last dim = full D_in (legal).
                pl.BlockSpec((TB, D_in), lambda i: (i, 0)),
                # Weights/biases VMEM-resident (index_map -> (0, 0)).
                pl.BlockSpec((D_in, Dp_hid), lambda i: (0, 0)),
                pl.BlockSpec((1, Dp_hid), lambda i: (0, 0)),
                pl.BlockSpec((Dp_hid, D_out), lambda i: (0, 0)),
                pl.BlockSpec((1, D_out), lambda i: (0, 0)),
            ],
            # Output streamed by batch tile; last dim = full D_out (legal).
            out_specs=pl.BlockSpec((TB, D_out), lambda i: (i, 0)),
        ),
        compiler_params=pltpu.CompilerParams(
            # Batch tiles are independent -> shardable across v7x's 2 TCs.
            dimension_semantics=("parallel",),
        ),
        cost_estimate=pl.CostEstimate(
            flops=flops, transcendentals=0, bytes_accessed=bytes_accessed),
    )(xp, w1p, b1p, w2p, b2p)

    return out if Bp == B else out[:B]


def init_params(key, d_in=32, d_hid=64, d_out=16, dtype=jnp.float32):
    k1, k2, k3, k4 = jax.random.split(key, 4)
    w1 = jax.random.normal(k1, (d_in, d_hid), dtype) * (1.0 / jnp.sqrt(d_in))
    b1 = jax.random.normal(k2, (1, d_hid), dtype) * 0.01
    w2 = jax.random.normal(k3, (d_hid, d_out), dtype) * (1.0 / jnp.sqrt(d_hid))
    b2 = jax.random.normal(k4, (1, d_out), dtype) * 0.01
    return w1, b1, w2, b2


def reference_forward_f32(x, params):
    """Plain-JAX f32 reference of the chained Sequential semantics."""
    w1, b1, w2, b2 = params
    h = jnp.maximum(x @ w1 + b1, 0.0)
    return h @ w2 + b2


def reference_forward_bf16(x, params, compute_dtype=jnp.bfloat16):
    """Reference mirroring the kernel's bf16-operand / f32-accum path."""
    w1, b1, w2, b2 = params
    h = jnp.dot(x.astype(compute_dtype), w1.astype(compute_dtype),
                preferred_element_type=jnp.float32) + b1
    h = jnp.maximum(h, 0.0)
    y = jnp.dot(h.astype(compute_dtype), w2.astype(compute_dtype),
                preferred_element_type=jnp.float32) + b2
    return y


if __name__ == "__main__":
    key = jax.random.PRNGKey(0)
    kx, kp = jax.random.split(key)

    B, D_in, D_hid, D_out = 8, 32, 64, 16
    x = jax.random.normal(kx, (B, D_in), jnp.float32)
    params = init_params(kp, d_in=D_in, d_hid=D_hid, d_out=D_out)

    prepared = prepare_params(params)               # one-time weight prep
    out = sequential_forward(x, prepared)
    out = jax.block_until_ready(out)

    ref_bf16 = reference_forward_bf16(x, params)
    ref_f32 = reference_forward_f32(x, params)
    assert out.shape == ref_f32.shape, (out.shape, ref_f32.shape)

    out_f32 = out.astype(jnp.float32)
    # Tight check against the matching bf16-compute reference (output is bf16,
    # so allow its rounding on top).
    assert jnp.allclose(out_f32, ref_bf16, atol=3e-2, rtol=2e-2), \
        "mismatch vs bf16 reference"
    # Loose sanity check against pure-f32 math (bf16 mantissa tolerance).
    assert jnp.allclose(out_f32, ref_f32, atol=1e-1, rtol=1e-1), \
        "mismatch vs f32 reference"

    # TODO(synk): Module bookkeeping (parameters/summary/state_dict/to/
    # grad_norm and Sequential's verbose printing) is pure Python container
    # logic with no kernel equivalent; only the forward pass is lowered.
    print("KERNEL_OK")
</pallas_src>

<mosaic_0001>
module attributes {stable_mosaic.version = 11 : i64} {
  func.func @_sequential_kernel(%arg0: i32, %arg1: memref<8x32xf32, #tpu.memory_space<vmem>>, %arg2: memref<32x128xbf16, #tpu.memory_space<vmem>>, %arg3: memref<1x128xf32, #tpu.memory_space<vmem>>, %arg4: memref<128x16xbf16, #tpu.memory_space<vmem>>, %arg5: memref<1x16xf32, #tpu.memory_space<vmem>>, %arg6: memref<8x16xbf16, #tpu.memory_space<vmem>>) attributes {dimension_semantics = [#tpu.dimension_semantics<parallel>], iteration_bounds = array<i64: 1>, scalar_prefetch = 0 : i64, scratch_operands = 0 : i64, tpu.core_type = #tpu.core_type<tc>, window_params = [{transform_indices = @transform_0, window_bounds = array<i64: 8, 32>}, {pipeline_mode = #tpu.pipeline_mode<synchronous>, transform_indices = @transform_1, window_bounds = array<i64: 32, 128>}, {pipeline_mode = #tpu.pipeline_mode<synchronous>, transform_indices = @transform_2, window_bounds = array<i64: 1, 128>}, {pipeline_mode = #tpu.pipeline_mode<synchronous>, transform_indices = @transform_3, window_bounds = array<i64: 128, 16>}, {pipeline_mode = #tpu.pipeline_mode<synchronous>, transform_indices = @transform_4, window_bounds = array<i64: 1, 16>}, {transform_indices = @transform_5, window_bounds = array<i64: 8, 16>}]} {
    %c0 = arith.constant 0 : index
    %c0_0 = arith.constant 0 : index
    %0 = vector.load %arg1[%c0, %c0_0] : memref<8x32xf32, #tpu.memory_space<vmem>>, vector<8x32xf32>
    %1 = arith.truncf %0 : vector<8x32xf32> to vector<8x32xbf16>
    %c0_1 = arith.constant 0 : index
    %c0_2 = arith.constant 0 : index
    %2 = vector.load %arg2[%c0_1, %c0_2] : memref<32x128xbf16, #tpu.memory_space<vmem>>, vector<32x128xbf16>
    %cst = arith.constant dense<0.000000e+00> : vector<8x128xf32>
    %3 = tpu.matmul %1, %2, %cst {dimension_numbers = #tpu.dot_dimension_numbers<[1], [0], [0], [1], [0, 0, 1, 1], [], []>} : vector<8x32xbf16>, vector<32x128xbf16>, vector<8x128xf32> -> vector<8x128xf32>
    %c0_3 = arith.constant 0 : index
    %c0_4 = arith.constant 0 : index
    %4 = vector.load %arg3[%c0_3, %c0_4] : memref<1x128xf32, #tpu.memory_space<vmem>>, vector<1x128xf32>
    %5 = vector.broadcast %4 : vector<1x128xf32> to vector<8x128xf32>
    %6 = arith.addf %3, %5 : vector<8x128xf32>
    %cst_5 = arith.constant 0.000000e+00 : f32
    %7 = vector.broadcast %cst_5 : f32 to vector<8x128xf32>
    %8 = arith.maximumf %6, %7 : vector<8x128xf32>
    %9 = arith.truncf %8 : vector<8x128xf32> to vector<8x128xbf16>
    %c0_6 = arith.constant 0 : index
    %c0_7 = arith.constant 0 : index
    %10 = vector.load %arg4[%c0_6, %c0_7] : memref<128x16xbf16, #tpu.memory_space<vmem>>, vector<128x16xbf16>
    %cst_8 = arith.constant dense<0.000000e+00> : vector<8x16xf32>
    %11 = tpu.matmul %9, %10, %cst_8 {dimension_numbers = #tpu.dot_dimension_numbers<[1], [0], [0], [1], [0, 0, 1, 1], [], []>} : vector<8x128xbf16>, vector<128x16xbf16>, vector<8x16xf32> -> vector<8x16xf32>
    %c0_9 = arith.constant 0 : index
    %c0_10 = arith.constant 0 : index
    %12 = vector.load %arg5[%c0_9, %c0_10] : memref<1x16xf32, #tpu.memory_space<vmem>>, vector<1x16xf32>
    %13 = vector.broadcast %12 : vector<1x16xf32> to vector<8x16xf32>
    %14 = arith.addf %11, %13 : vector<8x16xf32>
    %15 = arith.truncf %14 : vector<8x16xf32> to vector<8x16xbf16>
    %c0_11 = arith.constant 0 : index
    %c0_12 = arith.constant 0 : index
    %16 = vector.load %arg6[%c0_11, %c0_12] : memref<8x16xbf16, #tpu.memory_space<vmem>>, vector<8x16xbf16>
    tpu.vector_store %arg6[%c0_11, %c0_12], %15 {strides = array<i32>} : memref<8x16xbf16, #tpu.memory_space<vmem>>, vector<8x16xbf16>,
    return
  }
  func.func @transform_0(%arg0: i32) -> (i32, i32) {
    %c0_i32 = arith.constant 0 : i32
    %c0_i32_0 = arith.constant 0 : i32
    return %arg0, %c0_i32 : i32, i32
  }
  func.func @transform_1(%arg0: i32) -> (i32, i32) {
    %c0_i32 = arith.constant 0 : i32
    %c0_i32_0 = arith.constant 0 : i32
    %c0_i32_1 = arith.constant 0 : i32
    return %c0_i32, %c0_i32_0 : i32, i32
  }
  func.func @transform_2(%arg0: i32) -> (i32, i32) {
    %c0_i32 = arith.constant 0 : i32
    %c0_i32_0 = arith.constant 0 : i32
    %c0_i32_1 = arith.constant 0 : i32
    return %c0_i32, %c0_i32_0 : i32, i32
  }
  func.func @transform_3(%arg0: i32) -> (i32, i32) {
    %c0_i32 = arith.constant 0 : i32
    %c0_i32_0 = arith.constant 0 : i32
    %c0_i32_1 = arith.constant 0 : i32
    return %c0_i32, %c0_i32_0 : i32, i32
  }
  func.func @transform_4(%arg0: i32) -> (i32, i32) {
    %c0_i32 = arith.constant 0 : i32
    %c0_i32_0 = arith.constant 0 : i32
    %c0_i32_1 = arith.constant 0 : i32
    return %c0_i32, %c0_i32_0 : i32, i32
  }
  func.func @transform_5(%arg0: i32) -> (i32, i32) {
    %c0_i32 = arith.constant 0 : i32
    %c0_i32_0 = arith.constant 0 : i32
    return %arg0, %c0_i32 : i32, i32
  }
}

</mosaic_0001>

<bundles_post_ra>
// kernel: tpu_custom_call.1
= control target key start
LH: loop header
LB: loop body
LE: loop exit
PB: predicated region body
PF: predicated region fallthrough
CT: control target
= control target key end

     0   :  { %v311_v1 = vmov 0.0   ;;  %vm312_vm0 = vmmov 0   ;;  %vm47_vm1 = vcmask 261120   ;;  %s395_s0 = inlined_call_operand.vmem [shape: f32[8,32], index: 0, kind: input, shape index: {}]   ;;  %s396_s1 = inlined_call_operand.vmem [shape: bf16[32,128], index: 1, kind: input, shape index: {}]   ;;  %s397_s2 = inlined_call_operand.vmem [shape: f32[1,128], index: 2, kind: input, shape index: {}]   ;;  %s398_s3 = inlined_call_operand.vmem [shape: bf16[128,16], index: 3, kind: input, shape index: {}]   ;;  %s399_s4 = inlined_call_operand.vmem [shape: f32[1,16], index: 4, kind: input, shape index: {}]   ;;  %s400_s5 = inlined_call_operand.hbm [shape: bf16[8,16], index: 5, kind: output, shape index: {}]  }
   0x1   :  { %v277_v0 = vld [vmem:[%s396_s1] sm:$0xff]   ;;  %246 = vmatprep.subr.bf16.mxu0 %v311_v1  ;;  %v278_v2 = vld [vmem:[%s396_s1 + $0x8] sm:$0xff]   ;;  %254 = vmatprep.subr.bf16.mxu1 %v311_v1  ;;  %v281_v7 = vld [vmem:[%s398_s3 + $0x10] sm:$0xff]  }
   0x2   :  { %247 = vmatpush3.bf16.msra.mxu0 %v277_v0  ;;  %250 = vmatprep.mubr.msk.bf16.mxu0 %vm312_vm0, %v311_v1  ;;  %v22_v3 = vld [vmem:[%s395_s0] sm:$0xff]  ;;  %v280_v6 = vld [vmem:[%s398_s3 + $0x8] sm:$0xff]  }
   0x3   :  { %248 = vmatprep.subr.bf16.mxu0 %v311_v1  ;;  %v279_v4 = vld [vmem:[%s398_s3] sm:$0xff]   ;;  %270 = vmatprep.mubr.msk.bf16.mxu1 %vm312_vm0, %v311_v1  ;;  %v23_v5 = vpack.c.bf16 %v22_v3, %v22_v3 }
   0x4   :  { %255 = vmatpush3.bf16.msra.mxu1 %v279_v4 }
   0x5   :  { %256 = vmatprep.subr.bf16.mxu1 %v311_v1 }
   0x6   :  { %249 = vmatpush3.bf16.msra.mxu0 %v278_v2 }
   0x8   :  { %257 = vmatpush3.bf16.msra.mxu1 %v280_v6 }
   0x9   :  { %251 = vmatmul.mubr.msk.bf16.vlgmr.msra.gmra.mrb[0].mxu0 %vm47_vm1, %v23_v5  ;;  %258 = vmatprep.subr.bf16.mxu1 %v311_v1 }
   0xa   :  { %10 = vsyncpa [#allocation3], 0  ;;  %v282_v8 = vld [vmem:[%s398_s3 + $0x18] sm:$0xff]   ;;  %v283_v9 = vld [vmem:[%s398_s3 + $0x20] sm:$0xff]   ;;  %s313_s17 = smov [#allocation2]   ;;  %vm205_vm2 = vcmask 125952  }
   0xb   :  { %v284_v10 = vld [vmem:[%s398_s3 + $0x28] sm:$0xff]   ;;  %v285_v11 = vld [vmem:[%s398_s3 + $0x30] sm:$0xff]   ;;  %v286_v12 = vld [vmem:[%s398_s3 + $0x38] sm:$0xff]   ;;  %s213_s3 = sshll.u32 %s313_s17, 4  ;;  %s214_s3 = int_to_ptr.vmem [resolvable:$true] %s213_s3 }
   0xc   :  { %259 = vmatpush3.bf16.msra.mxu1 %v281_v7  ;;  %v221_v13 = vld [vmem:[%s397_s2] ss:$0 sm:$0xff]  ;;  %s287_s2 = scalar_lea.vmem %s214_s3, 64  ;;  %p292_p1 = scmp.lt.s32.totalorder %s214_s3, %s214_s3 }
   0xd   :  { %260 = vmatprep.subr.bf16.mxu1 %v311_v1  ;;  %v225_v21 = vld [vmem:[%s399_s4] ss:$0 sm:$0xff]  ;;  %p288_p0 = scmp.ne.s32.totalorder %s214_s3, %s287_s2  ;;  %p293_p2 = scmp.lt.s32.totalorder %s287_s2, %s287_s2 }
   0xf   :  { %p294_p3 = por %p293_p2, %p292_p1 }
  0x10   :  { %261 = vmatpush3.bf16.msra.mxu1 %v282_v8 }
  0x11   :  { %262 = vmatprep.subr.bf16.mxu1 %v311_v1  ;;  %p295_p4 = pnand %p294_p3, %p288_p0 }
  0x14   :  { %263 = vmatpush3.bf16.msra.mxu1 %v283_v9 }
  0x15   :  { %264 = vmatprep.subr.bf16.mxu1 %v311_v1 }
  0x18   :  { %265 = vmatpush3.bf16.msra.mxu1 %v284_v10 }
  0x19   :  { %266 = vmatprep.subr.bf16.mxu1 %v311_v1 }
  0x1c   :  { %267 = vmatpush3.bf16.msra.mxu1 %v285_v11 }
  0x1d   :  { %268 = vmatprep.subr.bf16.mxu1 %v311_v1 }
  0x20   :  { %269 = vmatpush3.bf16.msra.mxu1 %v286_v12 }
  0xdc   :  { %v85_v14 = vpop.f32.mrb[0].mxu0 }
  0xdd   :  { %v86_v15 = vadd.f32 %v221_v13, %v85_v14  ;;  %v252_v16 = vpop.f32.mrb[1].mxu0 }
  0xde   :  { %v88_v17 = vpop.f32.mrb[2].mxu0 }
  0xdf   :  { %v91_v18 = vmax.f32 %v86_v15, 0.0  ;;  %v253_v19 = vpop.f32.mrb[3].mxu0 }
  0xe1   :  { %v92_v20 = vpack.c.bf16 %v91_v18, %v91_v18 }
  0xe3   :  { %271 = vmatmul.mubr.bf16.vlgmr.msra.gmra.mrb[0].mxu1 %v92_v20 }
 0x1b6   :  { %v198_v22 = vpop.f32.mrb[0].mxu1 }
 0x1b7   :  { %v199_v23 = vadd.f32 %v225_v21, %v198_v22  ;;  %v272_v24 = vpop.f32.mrb[1].mxu1 }
 0x1b8   :  { %v201_v25 = vpop.f32.mrb[2].mxu1 }
 0x1b9   :  { %v204_v26 = vpack.c.bf16 %v199_v23, %v199_v23  ;;  %v273_v27 = vpop.f32.mrb[3].mxu1 }
 0x1bb   :  { %206 = vst.msk [vmem:[#allocation2] sm:$0xf] %vm205_vm2, %v204_v26 }
 0x1bc   :  { %298 = shalt.err (!%p295_p4)
}
 0x1bd   :  { %s299_s19 = scalar_lea.hbm %s400_s5, 64 }
 0x1be   :  { %p300_p5 = scmp.ne.s32.totalorder %s400_s5, %s299_s19  ;;  %p303_p6 = scmp.lt.u32.totalorder %s299_s19, %s400_s5 }
 0x1c0   :  { %p305_p7 = pnand %p303_p6, %p300_p5 }
 0x1c2   :  { %308 = shalt.err (!%p305_p7)
}
 0x1c3   :  { %216 = dma.vmem_to_hbm [thread:$0]  %s214_s3, 64, %s400_s5, [#allocation3]  }
 0x1c4   :  { %309 = dma.done.wait [#allocation3], 64  }
 0x1c5   :  { %310 = vsyncadd [#allocation3], 4294967232 }
 0x1c6   :  { %220 = vsyncpa [#allocation3], 1 }

</bundles_post_ra>
